<compile_context>
chip_gen: v7x
topology: tpu7x:2x2x1
jax: 0.10.0
libtpu: 0.0.40
codegen_flags: <defaults>
</compile_context>

<pallas_src>
import functools
import math

import jax
import jax.numpy as jnp
import numpy as np
from jax.experimental import pallas as pl
from jax.experimental.pallas import tpu as pltpu


# ------------------------------ config ------------------------------------- #

class BertConfig:
    def __init__(self, hidden_size=1280, num_attention_heads=8,
                 intermediate_size=2560, hidden_dropout_prob=0.1,
                 attention_probs_dropout_prob=0.1, hidden_act='gelu'):
        self.hidden_size = hidden_size
        self.num_attention_heads = num_attention_heads
        self.intermediate_size = intermediate_size
        self.hidden_dropout_prob = hidden_dropout_prob
        self.attention_probs_dropout_prob = attention_probs_dropout_prob
        self.hidden_act = hidden_act


# --------------------------- in-kernel activations -------------------------- #

_INV_SQRT2 = 0.7071067811865476


def _erf_approx(z):
    # Abramowitz & Stegun 7.1.26: max abs error 1.5e-7 (~float32 eps).
    # Uses only mul/add/div/exp so it always lowers inside Mosaic.
    a1, a2, a3, a4, a5 = (0.254829592, -0.284496736, 1.421413741,
                          -1.453152027, 1.061405429)
    p = 0.3275911
    sign = jnp.where(z >= 0.0, 1.0, -1.0)
    az = jnp.abs(z)
    t = 1.0 / (1.0 + p * az)
    poly = ((((a5 * t + a4) * t + a3) * t + a2) * t + a1) * t
    return sign * (1.0 - poly * jnp.exp(-az * az))


def _apply_act(x, act):
    if act == 'gelu':
        # Exact-erf gelu, matching the reference module (not the tanh variant).
        return x * 0.5 * (1.0 + _erf_approx(x * _INV_SQRT2))
    elif act == 'relu':
        return jnp.maximum(x, 0.0)
    elif act == 'swish':
        return x * jax.nn.sigmoid(x)
    else:
        raise ValueError(f"unsupported activation: {act!r}")


# ------------------------------ Pallas kernel ------------------------------- #

def _bert_intermediate_kernel(x_ref, w_ref, b_ref, o_ref, acc_ref, *, act):
    k = pl.program_id(2)

    @pl.when(k == 0)
    def _init():
        acc_ref[...] = jnp.zeros_like(acc_ref)

    acc_ref[...] += jnp.dot(x_ref[...], w_ref[...],
                            preferred_element_type=jnp.float32)

    @pl.when(k == pl.num_programs(2) - 1)
    def _finalize():
        z = acc_ref[...] + b_ref[...]            # (tm, tn) + (1, tn) broadcast
        o_ref[...] = _apply_act(z, act).astype(o_ref.dtype)


def _round_up(x, m):
    return ((x + m - 1) // m) * m


def _pick_tile(dim, candidates):
    for c in candidates:
        if dim % c == 0:
            return c
    return dim  # fall back to the full extent (allowed by BlockSpec rules)


@functools.partial(jax.jit, static_argnames=("act",))
def bert_intermediate_forward(x2d, w_t, b, act="gelu"):
    """GELU(x2d @ w_t + b) computed with a single fused Pallas kernel.

    x2d: (M, K) float32 tokens
    w_t: (K, N) float32  -- nn.Linear weight, pre-transposed
    b:   (N,)  float32
    """
    M, K = x2d.shape
    K2, N = w_t.shape
    assert K == K2 and b.shape == (N,)

    # Tile sizes: lane/sublane dense, reduction axis last in the grid.
    tk = _pick_tile(K, (512, 256, 128))
    tn = _pick_tile(N, (512, 256, 128))
    mp = _round_up(M, 8)
    tm = min(256, mp)
    mp = _round_up(M, tm)
    if mp != M:
        x2d = jnp.pad(x2d, ((0, mp - M), (0, 0)))

    b2d = b.reshape(1, N)
    grid = (mp // tm, N // tn, K // tk)

    out = pl.pallas_call(
        functools.partial(_bert_intermediate_kernel, act=act),
        out_shape=jax.ShapeDtypeStruct((mp, N), x2d.dtype),
        grid_spec=pltpu.PrefetchScalarGridSpec(
            num_scalar_prefetch=0,
            grid=grid,
            in_specs=[
                pl.BlockSpec((tm, tk), lambda i, j, k: (i, k)),   # activations
                pl.BlockSpec((tk, tn), lambda i, j, k: (k, j)),   # weight (K, N)
                pl.BlockSpec((1, tn), lambda i, j, k: (0, j)),    # bias
            ],
            out_specs=pl.BlockSpec((tm, tn), lambda i, j, k: (i, j)),
            scratch_shapes=[pltpu.VMEM((tm, tn), jnp.float32)],
        ),
        compiler_params=pltpu.CompilerParams(
            dimension_semantics=("parallel", "parallel", "arbitrary"),
        ),
    )(x2d, w_t, b2d)

    return out[:M] if mp != M else out


# ------------------------------ module wrapper ------------------------------ #

class BertIntermediatePallas:
    """JAX/Pallas re-implementation of BertIntermediate.forward."""

    def __init__(self, config, *, key):
        if not isinstance(config.hidden_act, str):
            # TODO(synk): arbitrary Python callables for hidden_act are not supported;
            # only the 'gelu' / 'relu' / 'swish' string options are wired up.
            raise ValueError("hidden_act must be one of 'gelu', 'relu', 'swish'")
        self.act = config.hidden_act
        H, I = config.hidden_size, config.intermediate_size
        k_w, k_b = jax.random.split(key)
        # nn.Linear(H, I) has weight (I, H); store it pre-transposed as (H, I) so
        # the intermediate axis is lane-dense inside the kernel.
        self.w_t = 0.02 * jax.random.normal(k_w, (H, I), dtype=jnp.float32)
        self.b = 0.02 * jax.random.normal(k_b, (I,), dtype=jnp.float32)

    def __call__(self, hidden_states):
        # hidden_states: (batch, seq, hidden_size)
        B, S, H = hidden_states.shape
        x2d = hidden_states.reshape(B * S, H)
        out = bert_intermediate_forward(x2d, self.w_t, self.b, act=self.act)
        return out.reshape(B, S, -1)


# ---------------------------------- demo ------------------------------------ #

if __name__ == "__main__":
    key = jax.random.PRNGKey(0)
    k_x, k_p = jax.random.split(key)

    # Small, tile-friendly shapes consistent with the module (BERT-style MLP).
    config = BertConfig(hidden_size=256, intermediate_size=512, hidden_act='gelu')
    batch, seq = 2, 8

    x = jax.random.normal(k_x, (batch, seq, config.hidden_size), dtype=jnp.float32)

    mod = BertIntermediatePallas(config, key=k_p)
    out = jax.block_until_ready(mod(x))
    assert out.shape == (batch, seq, config.intermediate_size), out.shape

    # Reference: exact erf-based gelu on the plain XLA matmul.
    x2d = x.reshape(-1, config.hidden_size)
    pre = jnp.dot(x2d, mod.w_t, preferred_element_type=jnp.float32) + mod.b
    ref = pre * 0.5 * (1.0 + jax.scipy.special.erf(pre / math.sqrt(2.0)))
    ref = ref.reshape(batch, seq, config.intermediate_size)

    assert np.allclose(np.asarray(out), np.asarray(ref), rtol=1e-3, atol=1e-3), \
        "BertIntermediate Pallas kernel mismatch vs reference"

    print("KERNEL_OK")
</pallas_src>

<mosaic_0001>
module attributes {stable_mosaic.version = 11 : i64} {
  func.func @_bert_intermediate_kernel(%arg0: i32, %arg1: i32, %arg2: i32, %arg3: memref<16x256xf32, #tpu.memory_space<vmem>>, %arg4: memref<256x512xf32, #tpu.memory_space<vmem>>, %arg5: memref<1x512xf32, #tpu.memory_space<vmem>>, %arg6: memref<16x512xf32, #tpu.memory_space<vmem>>, %arg7: memref<16x512xf32, #tpu.memory_space<vmem>>) attributes {dimension_semantics = [#tpu.dimension_semantics<parallel>, #tpu.dimension_semantics<parallel>, #tpu.dimension_semantics<arbitrary>], iteration_bounds = array<i64: 1, 1, 1>, scalar_prefetch = 0 : i64, scratch_operands = 1 : i64, tpu.core_type = #tpu.core_type<tc>, window_params = [{transform_indices = @transform_0, window_bounds = array<i64: 16, 256>}, {transform_indices = @transform_1, window_bounds = array<i64: 256, 512>}, {transform_indices = @transform_2, window_bounds = array<i64: 1, 512>}, {transform_indices = @transform_3, window_bounds = array<i64: 16, 512>}]} {
    %c0_i32 = arith.constant 0 : i32
    %0 = arith.cmpi eq, %arg2, %c0_i32 : i32
    %1 = arith.extui %0 : i1 to i32
    %c0_i32_0 = arith.constant 0 : i32
    %2 = arith.cmpi ne, %1, %c0_i32_0 : i32
    scf.if %2 {
      %cst_10 = arith.constant 0.000000e+00 : f32
      %12 = vector.broadcast %cst_10 : f32 to vector<16x512xf32>
      %c0_11 = arith.constant 0 : index
      %c0_12 = arith.constant 0 : index
      %13 = vector.load %arg7[%c0_11, %c0_12] : memref<16x512xf32, #tpu.memory_space<vmem>>, vector<16x512xf32>
      tpu.vector_store %arg7[%c0_11, %c0_12], %12 {strides = array<i32>} : memref<16x512xf32, #tpu.memory_space<vmem>>, vector<16x512xf32>,
    } else {
    }
    %c0 = arith.constant 0 : index
    %c0_1 = arith.constant 0 : index
    %3 = vector.load %arg7[%c0, %c0_1] : memref<16x512xf32, #tpu.memory_space<vmem>>, vector<16x512xf32>
    %c0_2 = arith.constant 0 : index
    %c0_3 = arith.constant 0 : index
    %4 = vector.load %arg3[%c0_2, %c0_3] : memref<16x256xf32, #tpu.memory_space<vmem>>, vector<16x256xf32>
    %c0_4 = arith.constant 0 : index
    %c0_5 = arith.constant 0 : index
    %5 = vector.load %arg4[%c0_4, %c0_5] : memref<256x512xf32, #tpu.memory_space<vmem>>, vector<256x512xf32>
    %cst = arith.constant dense<0.000000e+00> : vector<16x512xf32>
    %6 = tpu.matmul %4, %5, %cst {dimension_numbers = #tpu.dot_dimension_numbers<[1], [0], [0], [1], [0, 0, 1, 1], [], []>} : vector<16x256xf32>, vector<256x512xf32>, vector<16x512xf32> -> vector<16x512xf32>
    %7 = arith.addf %3, %6 : vector<16x512xf32>
    %c0_6 = arith.constant 0 : index
    %c0_7 = arith.constant 0 : index
    %8 = vector.load %arg7[%c0_6, %c0_7] : memref<16x512xf32, #tpu.memory_space<vmem>>, vector<16x512xf32>
    tpu.vector_store %arg7[%c0_6, %c0_7], %7 {strides = array<i32>} : memref<16x512xf32, #tpu.memory_space<vmem>>, vector<16x512xf32>,
    %c0_i32_8 = arith.constant 0 : i32
    %9 = arith.cmpi eq, %arg2, %c0_i32_8 : i32
    %10 = arith.extui %9 : i1 to i32
    %c0_i32_9 = arith.constant 0 : i32
    %11 = arith.cmpi ne, %10, %c0_i32_9 : i32
    scf.if %11 {
      %c0_10 = arith.constant 0 : index
      %c0_11 = arith.constant 0 : index
      %12 = vector.load %arg7[%c0_10, %c0_11] : memref<16x512xf32, #tpu.memory_space<vmem>>, vector<16x512xf32>
      %c0_12 = arith.constant 0 : index
      %c0_13 = arith.constant 0 : index
      %13 = vector.load %arg5[%c0_12, %c0_13] : memref<1x512xf32, #tpu.memory_space<vmem>>, vector<1x512xf32>
      %14 = vector.broadcast %13 : vector<1x512xf32> to vector<16x512xf32>
      %15 = arith.addf %12, %14 : vector<16x512xf32>
      %cst_14 = arith.constant 5.000000e-01 : f32
      %16 = vector.broadcast %cst_14 : f32 to vector<16x512xf32>
      %17 = arith.mulf %15, %16 : vector<16x512xf32>
      %cst_15 = arith.constant 0.707106769 : f32
      %18 = vector.broadcast %cst_15 : f32 to vector<16x512xf32>
      %19 = arith.mulf %15, %18 : vector<16x512xf32>
      %cst_16 = arith.constant 0.000000e+00 : f32
      %20 = vector.broadcast %cst_16 : f32 to vector<16x512xf32>
      %21 = arith.cmpf oge, %19, %20 : vector<16x512xf32>
      %cst_17 = arith.constant 1.000000e+00 : f32
      %cst_18 = arith.constant -1.000000e+00 : f32
      %22 = vector.broadcast %cst_17 : f32 to vector<16x512xf32>
      %23 = vector.broadcast %cst_18 : f32 to vector<16x512xf32>
      %24 = arith.select %21, %22, %23 : vector<16x512xi1>, vector<16x512xf32>
      %25 = math.absf %19 : vector<16x512xf32>
      %cst_19 = arith.constant 0.327591091 : f32
      %26 = vector.broadcast %cst_19 : f32 to vector<16x512xf32>
      %27 = arith.mulf %26, %25 : vector<16x512xf32>
      %cst_20 = arith.constant 1.000000e+00 : f32
      %28 = vector.broadcast %cst_20 : f32 to vector<16x512xf32>
      %29 = arith.addf %28, %27 : vector<16x512xf32>
      %cst_21 = arith.constant 1.000000e+00 : f32
      %30 = vector.broadcast %cst_21 : f32 to vector<16x512xf32>
      %31 = arith.divf %30, %29 : vector<16x512xf32>
      %cst_22 = arith.constant 1.06140542 : f32
      %32 = vector.broadcast %cst_22 : f32 to vector<16x512xf32>
      %33 = arith.mulf %32, %31 : vector<16x512xf32>
      %cst_23 = arith.constant -1.45315206 : f32
      %34 = vector.broadcast %cst_23 : f32 to vector<16x512xf32>
      %35 = arith.addf %33, %34 : vector<16x512xf32>
      %36 = arith.mulf %35, %31 : vector<16x512xf32>
      %cst_24 = arith.constant 1.42141378 : f32
      %37 = vector.broadcast %cst_24 : f32 to vector<16x512xf32>
      %38 = arith.addf %36, %37 : vector<16x512xf32>
      %39 = arith.mulf %38, %31 : vector<16x512xf32>
      %cst_25 = arith.constant -0.284496725 : f32
      %40 = vector.broadcast %cst_25 : f32 to vector<16x512xf32>
      %41 = arith.addf %39, %40 : vector<16x512xf32>
      %42 = arith.mulf %41, %31 : vector<16x512xf32>
      %cst_26 = arith.constant 0.254829586 : f32
      %43 = vector.broadcast %cst_26 : f32 to vector<16x512xf32>
      %44 = arith.addf %42, %43 : vector<16x512xf32>
      %45 = arith.mulf %44, %31 : vector<16x512xf32>
      %cst_27 = arith.constant 0.000000e+00 : f32
      %46 = vector.broadcast %cst_27 : f32 to vector<16x512xf32>
      %47 = arith.subf %46, %25 : vector<16x512xf32>
      %48 = arith.mulf %47, %25 : vector<16x512xf32>
      %49 = math.exp %48 : vector<16x512xf32>
      %50 = arith.mulf %45, %49 : vector<16x512xf32>
      %cst_28 = arith.constant 1.000000e+00 : f32
      %51 = vector.broadcast %cst_28 : f32 to vector<16x512xf32>
      %52 = arith.subf %51, %50 : vector<16x512xf32>
      %53 = arith.mulf %24, %52 : vector<16x512xf32>
      %cst_29 = arith.constant 1.000000e+00 : f32
      %54 = vector.broadcast %cst_29 : f32 to vector<16x512xf32>
      %55 = arith.addf %54, %53 : vector<16x512xf32>
      %56 = arith.mulf %17, %55 : vector<16x512xf32>
      %c0_30 = arith.constant 0 : index
      %c0_31 = arith.constant 0 : index
      %57 = vector.load %arg6[%c0_30, %c0_31] : memref<16x512xf32, #tpu.memory_space<vmem>>, vector<16x512xf32>
      tpu.vector_store %arg6[%c0_30, %c0_31], %56 {strides = array<i32>} : memref<16x512xf32, #tpu.memory_space<vmem>>, vector<16x512xf32>,
    } else {
    }
    return
  }
  func.func @transform_0(%arg0: i32, %arg1: i32, %arg2: i32) -> (i32, i32) {
    %c0_i32 = arith.constant 0 : i32
    return %arg0, %arg2 : i32, i32
  }
  func.func @transform_1(%arg0: i32, %arg1: i32, %arg2: i32) -> (i32, i32) {
    %c0_i32 = arith.constant 0 : i32
    return %arg2, %arg1 : i32, i32
  }
  func.func @transform_2(%arg0: i32, %arg1: i32, %arg2: i32) -> (i32, i32) {
    %c0_i32 = arith.constant 0 : i32
    %c0_i32_0 = arith.constant 0 : i32
    return %c0_i32, %arg1 : i32, i32
  }
  func.func @transform_3(%arg0: i32, %arg1: i32, %arg2: i32) -> (i32, i32) {
    %c0_i32 = arith.constant 0 : i32
    return %arg0, %arg1 : i32, i32
  }
}

</mosaic_0001>

<bundles_post_ra>
// kernel: bert_intermediate_forward.1
= control target key start
LH: loop header
LB: loop body
LE: loop exit
PB: predicated region body
PF: predicated region fallthrough
CT: control target
= control target key end

     0   :  { %8 = vsyncpa [#allocation4], 0  ;;  %s1105_s0 = inlined_call_operand.hbm [shape: f32[16,256], index: 0, kind: input, shape index: {}]   ;;  %s1106_s1 = inlined_call_operand.hbm [shape: f32[256,512], index: 1, kind: input, shape index: {}]   ;;  %s1107_s2 = inlined_call_operand.vmem [shape: f32[1,512], index: 2, kind: input, shape index: {}]   ;;  %s1108_s3 = inlined_call_operand.hbm [shape: f32[16,512], index: 3, kind: output, shape index: {}]  }
   0x1   :  { %9 = vsyncpa [#allocation7], 0 }
   0x2   :  { %10 = vsyncpa [#allocation5], 0  ;;  %s888_s12 = smov [#allocation3]   ;;  %s816_s16 = scalar_lea.hbm %s1105_s0, 512 }
   0x3   :  { %s16_s13 = sshll.u32 %s888_s12, 4  ;;  %p817_p0 = scmp.ne.s32.totalorder %s1105_s0, %s816_s16  ;;  %s17_s13 = int_to_ptr.vmem [resolvable:$true] %s16_s13 }
   0x4   :  { %p820_p1 = scmp.lt.u32.totalorder %s816_s16, %s1105_s0 }
   0x6   :  { %p822_p2 = pnand %p820_p1, %p817_p0 }
   0x8   :  { %825 = shalt.err (!%p822_p2)
}
   0x9   :  { %s826_s21 = scalar_lea.vmem %s17_s13, 512  ;;  %p831_p4 = scmp.lt.s32.totalorder %s17_s13, %s17_s13 }
   0xa   :  { %p827_p3 = scmp.ne.s32.totalorder %s17_s13, %s826_s21  ;;  %p832_p5 = scmp.lt.s32.totalorder %s826_s21, %s826_s21 }
   0xc   :  { %p833_p6 = por %p832_p5, %p831_p4 }
   0xe   :  { %p834_p7 = pnand %p833_p6, %p827_p3 }
  0x10   :  { %837 = shalt.err (!%p834_p7)
}
  0x11   :  { %s889_s22 = smov 256   ;;  %s890_s23 = smov 16  }
  0x12   :  { %22 = dma.hbm_to_vmem [thread:$0]  %s1105_s0, 512, %s17_s13, [#allocation4], %s889_s22, %s889_s22, %s890_s23  }
  0x13   :  { %s891_s26 = smov [#allocation6]   ;;  %s838_s30 = scalar_lea.hbm %s1106_s1, 16384 }
  0x14   :  { %s28_s27 = sshll.u32 %s891_s26, 4  ;;  %p839_p8 = scmp.ne.s32.totalorder %s1106_s1, %s838_s30  ;;  %s29_s27 = int_to_ptr.vmem [resolvable:$true] %s28_s27 }
  0x15   :  { %p842_p9 = scmp.lt.u32.totalorder %s838_s30, %s1106_s1 }
  0x17   :  { %p844_p10 = pnand %p842_p9, %p839_p8 }
  0x19   :  { %847 = shalt.err (!%p844_p10)
}
  0x1a   :  { %s848_s8 = scalar_lea.vmem %s29_s27, 16384  ;;  %p853_p12 = scmp.lt.s32.totalorder %s29_s27, %s29_s27 }
  0x1b   :  { %p849_p11 = scmp.ne.s32.totalorder %s29_s27, %s848_s8  ;;  %p854_p13 = scmp.lt.s32.totalorder %s848_s8, %s848_s8 }
  0x1d   :  { %p855_p0 = por %p854_p13, %p853_p12 }
  0x1f   :  { %p856_p1 = pnand %p855_p0, %p849_p11 }
  0x21   :  { %859 = shalt.err (!%p856_p1)
}
  0x22   :  { %s892_s0 = smov 512   ;;  %s893_s9 = smov 32  }
  0x23   :  { %34 = dma.hbm_to_vmem [thread:$0]  %s1106_s1, 16384, %s29_s27, [#allocation7], %s892_s0, %s892_s0, %s893_s9  }
  0x24   :  { %882 = dma.done.wait [#allocation4], 512  }
  0x25   :  { %883 = vsyncadd [#allocation4], 4294966784 }
  0x26   :  { %884 = dma.done.wait [#allocation7], 16384  }
  0x27   :  { %885 = vsyncadd [#allocation7], 4294950912  ;;  %v68_v0 = vld [vmem:[#allocation6 + $0x8] sm:$0xff]  ;;  %v70_v2 = vld [vmem:[#allocation6 + $0x18] sm:$0xff] }
  0x28   :  { %v72_v1 = vld [vmem:[#allocation6 + $0x28] sm:$0xff]  ;;  %v74_v4 = vld [vmem:[#allocation6 + $0x38] sm:$0xff]  ;;  %v67_v5 = vld [vmem:[#allocation6] sm:$0xff] }
  0x29   :  { %v648_v3 = vpack.c.bf16 %v72_v1, %v68_v0  ;;  %v71_v6 = vld [vmem:[#allocation6 + $0x20] sm:$0xff]  ;;  %v712_v7 = vpack.c.bf16 %v74_v4, %v70_v2  ;;  %v69_v9 = vld [vmem:[#allocation6 + $0x10] sm:$0xff]  ;;  %v76_v11 = vld [vmem:[#allocation6 + $0x48] sm:$0xff] }
  0x2a   :  { %v650_v8 = vpack.c.bf16 %v71_v6, %v67_v5  ;;  %v73_v10 = vld [vmem:[#allocation6 + $0x30] sm:$0xff]  ;;  %v80_v13 = vld [vmem:[#allocation6 + $0x68] sm:$0xff]  ;;  %v78_v14 = vld [vmem:[#allocation6 + $0x58] sm:$0xff] }
  0x2b   :  { %649 = vmatprep.subr.bf16.mxu0 %v648_v3  ;;  %v714_v12 = vpack.c.bf16 %v73_v10, %v69_v9  ;;  %v82_v15 = vld [vmem:[#allocation6 + $0x78] sm:$0xff]  ;;  %713 = vmatprep.subr.bf16.mxu1 %v712_v7  ;;  %v652_v16 = vpack.c.bf16 %v80_v13, %v76_v11  ;;  %v75_v18 = vld [vmem:[#allocation6 + $0x40] sm:$0xff]  ;;  %v77_v20 = vld [vmem:[#allocation6 + $0x50] sm:$0xff] }
  0x2c   :  { %651 = vmatpush1.bf16.msra.mxu0 %v650_v8  ;;  %v716_v17 = vpack.c.bf16 %v82_v15, %v78_v14  ;;  %v79_v19 = vld [vmem:[#allocation6 + $0x60] sm:$0xff]  ;;  %v81_v22 = vld [vmem:[#allocation6 + $0x70] sm:$0xff]  ;;  %v84_v23 = vld [vmem:[#allocation6 + $0x88] sm:$0xff] }
  0x2d   :  { %715 = vmatpush1.bf16.msra.mxu1 %v714_v12  ;;  %v654_v21 = vpack.c.bf16 %v79_v19, %v75_v18  ;;  %v88_v24 = vld [vmem:[#allocation6 + $0xa8] sm:$0xff]  ;;  %653 = vmatprep.subr.bf16.mxu0 %v652_v16  ;;  %v718_v25 = vpack.c.bf16 %v81_v22, %v77_v20  ;;  %v86_v27 = vld [vmem:[#allocation6 + $0x98] sm:$0xff]  ;;  %v83_v29 = vld [vmem:[#allocation6 + $0x80] sm:$0xff] }
  0x2e   :  { %717 = vmatprep.subr.bf16.mxu1 %v716_v17  ;;  %v656_v26 = vpack.c.bf16 %v88_v24, %v84_v23  ;;  %v90_v28 = vld [vmem:[#allocation6 + $0xb8] sm:$0xff]  ;;  %v87_v31 = vld [vmem:[#allocation6 + $0xa0] sm:$0xff]  ;;  %v85_v32 = vld [vmem:[#allocation6 + $0x90] sm:$0xff] }
  0x2f   :  { %v720_v30 = vpack.c.bf16 %v90_v28, %v86_v27  ;;  %v89_v33 = vld [vmem:[#allocation6 + $0xb0] sm:$0xff]  ;;  %v658_v34 = vpack.c.bf16 %v87_v31, %v83_v29  ;;  %v92_v35 = vld [vmem:[#allocation6 + $0xc8] sm:$0xff]  ;;  %v94_v37 = vld [vmem:[#allocation6 + $0xd8] sm:$0xff] }
  0x30   :  { %655 = vmatpush1.bf16.msra.mxu0 %v654_v21  ;;  %v96_v36 = vld [vmem:[#allocation6 + $0xe8] sm:$0xff]  ;;  %v722_v38 = vpack.c.bf16 %v89_v33, %v85_v32  ;;  %v98_v40 = vld [vmem:[#allocation6 + $0xf8] sm:$0xff]  ;;  %v91_v41 = vld [vmem:[#allocation6 + $0xc0] sm:$0xff] }
  0x31   :  { %719 = vmatpush1.bf16.msra.mxu1 %v718_v25  ;;  %657 = vmatprep.subr.bf16.mxu0 %v656_v26  ;;  %v660_v39 = vpack.c.bf16 %v96_v36, %v92_v35  ;;  %v95_v42 = vld [vmem:[#allocation6 + $0xe0] sm:$0xff]  ;;  %v724_v43 = vpack.c.bf16 %v98_v40, %v94_v37  ;;  %v93_v44 = vld [vmem:[#allocation6 + $0xd0] sm:$0xff]  ;;  %v100_v46 = vld [vmem:[#allocation6 + $0x108] sm:$0xff] }
  0x32   :  { %721 = vmatprep.subr.bf16.mxu1 %v720_v30  ;;  %v97_v45 = vld [vmem:[#allocation6 + $0xf0] sm:$0xff]  ;;  %v104_v47 = vld [vmem:[#allocation6 + $0x128] sm:$0xff]  ;;  %v102_v48 = vld [vmem:[#allocation6 + $0x118] sm:$0xff]  ;;  %v662_v50 = vpack.c.bf16 %v95_v42, %v91_v41 }
  0x33   :  { %v106_v49 = vld [vmem:[#allocation6 + $0x138] sm:$0xff]  ;;  %v726_v51 = vpack.c.bf16 %v97_v45, %v93_v44  ;;  %v664_v52 = vpack.c.bf16 %v104_v47, %v100_v46  ;;  %v99_v53 = vld [vmem:[#allocation6 + $0x100] sm:$0xff]  ;;  %v101_v55 = vld [vmem:[#allocation6 + $0x110] sm:$0xff] }
  0x34   :  { %659 = vmatpush1.bf16.msra.mxu0 %v658_v34  ;;  %v103_v54 = vld [vmem:[#allocation6 + $0x120] sm:$0xff]  ;;  %v728_v56 = vpack.c.bf16 %v106_v49, %v102_v48  ;;  %v105_v57 = vld [vmem:[#allocation6 + $0x130] sm:$0xff]  ;;  %v108_v58 = vld [vmem:[#allocation6 + $0x148] sm:$0xff] }
  0x35   :  { %723 = vmatpush1.bf16.msra.mxu1 %v722_v38  ;;  %661 = vmatprep.subr.bf16.mxu0 %v660_v39  ;;  %v112_v59 = vld [vmem:[#allocation6 + $0x168] sm:$0xff]  ;;  %v110_v60 = vld [vmem:[#allocation6 + $0x158] sm:$0xff]  ;;  %v666_v62 = vpack.c.bf16 %v103_v54, %v99_v53  ;;  %v730_v63 = vpack.c.bf16 %v105_v57, %v101_v55  ;;  %v107_v1 = vld [vmem:[#allocation6 + $0x140] sm:$0xff] }
  0x36   :  { %725 = vmatprep.subr.bf16.mxu1 %v724_v43  ;;  %v114_v61 = vld [vmem:[#allocation6 + $0x178] sm:$0xff]  ;;  %v668_v0 = vpack.c.bf16 %v112_v59, %v108_v58  ;;  %v111_v2 = vld [vmem:[#allocation6 + $0x160] sm:$0xff]  ;;  %v109_v3 = vld [vmem:[#allocation6 + $0x150] sm:$0xff] }
  0x37   :  { %v732_v4 = vpack.c.bf16 %v114_v61, %v110_v60  ;;  %v113_v5 = vld [vmem:[#allocation6 + $0x170] sm:$0xff]  ;;  %v116_v6 = vld [vmem:[#allocation6 + $0x188] sm:$0xff]  ;;  %v118_v8 = vld [vmem:[#allocation6 + $0x198] sm:$0xff]  ;;  %v670_v10 = vpack.c.bf16 %v111_v2, %v107_v1 }
  0x38   :  { %663 = vmatpush1.bf16.msra.mxu0 %v662_v50  ;;  %v120_v7 = vld [vmem:[#allocation6 + $0x1a8] sm:$0xff]  ;;  %v122_v9 = vld [vmem:[#allocation6 + $0x1b8] sm:$0xff]  ;;  %v734_v11 = vpack.c.bf16 %v113_v5, %v109_v3  ;;  %v115_v13 = vld [vmem:[#allocation6 + $0x180] sm:$0xff] }
  0x39   :  { %727 = vmatpush1.bf16.msra.mxu1 %v726_v51  ;;  %665 = vmatprep.subr.bf16.mxu0 %v664_v52  ;;  %v672_v12 = vpack.c.bf16 %v120_v7, %v116_v6  ;;  %v119_v14 = vld [vmem:[#allocation6 + $0x1a0] sm:$0xff]  ;;  %v117_v15 = vld [vmem:[#allocation6 + $0x190] sm:$0xff]  ;;  %v736_v16 = vpack.c.bf16 %v122_v9, %v118_v8  ;;  %v124_v18 = vld [vmem:[#allocation6 + $0x1c8] sm:$0xff] }
  0x3a   :  { %729 = vmatprep.subr.bf16.mxu1 %v728_v56  ;;  %v121_v17 = vld [vmem:[#allocation6 + $0x1b0] sm:$0xff]  ;;  %v128_v19 = vld [vmem:[#allocation6 + $0x1e8] sm:$0xff]  ;;  %v126_v20 = vld [vmem:[#allocation6 + $0x1d8] sm:$0xff]  ;;  %v674_v22 = vpack.c.bf16 %v119_v14, %v115_v13 }
  0x3b   :  { %v130_v21 = vld [vmem:[#allocation6 + $0x1f8] sm:$0xff]  ;;  %v738_v23 = vpack.c.bf16 %v121_v17, %v117_v15  ;;  %v676_v24 = vpack.c.bf16 %v128_v19, %v124_v18  ;;  %v123_v25 = vld [vmem:[#allocation6 + $0x1c0] sm:$0xff]  ;;  %v125_v27 = vld [vmem:[#allocation6 + $0x1d0] sm:$0xff] }
  0x3c   :  { %667 = vmatpush1.bf16.msra.mxu0 %v666_v62  ;;  %v127_v26 = vld [vmem:[#allocation6 + $0x1e0] sm:$0xff]  ;;  %v740_v28 = vpack.c.bf16 %v130_v21, %v126_v20  ;;  %v129_v29 = vld [vmem:[#allocation6 + $0x1f0] sm:$0xff]  ;;  %v132_v30 = vld [vmem:[#allocation6 + $0x208] sm:$0xff] }
  0x3d   :  { %731 = vmatpush1.bf16.msra.mxu1 %v730_v63  ;;  %669 = vmatprep.subr.bf16.mxu0 %v668_v0  ;;  %v136_v31 = vld [vmem:[#allocation6 + $0x228] sm:$0xff]  ;;  %v134_v32 = vld [vmem:[#allocation6 + $0x218] sm:$0xff]  ;;  %v678_v34 = vpack.c.bf16 %v127_v26, %v123_v25  ;;  %v742_v35 = vpack.c.bf16 %v129_v29, %v125_v27  ;;  %v131_v37 = vld [vmem:[#allocation6 + $0x200] sm:$0xff] }
  0x3e   :  { %733 = vmatprep.subr.bf16.mxu1 %v732_v4  ;;  %v138_v33 = vld [vmem:[#allocation6 + $0x238] sm:$0xff]  ;;  %v680_v36 = vpack.c.bf16 %v136_v31, %v132_v30  ;;  %v135_v38 = vld [vmem:[#allocation6 + $0x220] sm:$0xff]  ;;  %v133_v39 = vld [vmem:[#allocation6 + $0x210] sm:$0xff] }
  0x3f   :  { %v744_v40 = vpack.c.bf16 %v138_v33, %v134_v32  ;;  %v137_v41 = vld [vmem:[#allocation6 + $0x230] sm:$0xff]  ;;  %v140_v42 = vld [vmem:[#allocation6 + $0x248] sm:$0xff]  ;;  %v142_v44 = vld [vmem:[#allocation6 + $0x258] sm:$0xff]  ;;  %v682_v46 = vpack.c.bf16 %v135_v38, %v131_v37 }
  0x40   :  { %671 = vmatpush1.bf16.msra.mxu0 %v670_v10  ;;  %v144_v43 = vld [vmem:[#allocation6 + $0x268] sm:$0xff]  ;;  %v146_v45 = vld [vmem:[#allocation6 + $0x278] sm:$0xff]  ;;  %v746_v47 = vpack.c.bf16 %v137_v41, %v133_v39  ;;  %v139_v49 = vld [vmem:[#allocation6 + $0x240] sm:$0xff] }
  0x41   :  { %735 = vmatpush1.bf16.msra.mxu1 %v734_v11  ;;  %673 = vmatprep.subr.bf16.mxu0 %v672_v12  ;;  %v684_v48 = vpack.c.bf16 %v144_v43, %v140_v42  ;;  %v143_v50 = vld [vmem:[#allocation6 + $0x260] sm:$0xff]  ;;  %v141_v51 = vld [vmem:[#allocation6 + $0x250] sm:$0xff]  ;;  %v748_v52 = vpack.c.bf16 %v146_v45, %v142_v44  ;;  %v148_v54 = vld [vmem:[#allocation6 + $0x288] sm:$0xff] }
  0x42   :  { %737 = vmatprep.subr.bf16.mxu1 %v736_v16  ;;  %v145_v53 = vld [vmem:[#allocation6 + $0x270] sm:$0xff]  ;;  %v152_v55 = vld [vmem:[#allocation6 + $0x2a8] sm:$0xff]  ;;  %v150_v56 = vld [vmem:[#allocation6 + $0x298] sm:$0xff]  ;;  %v686_v58 = vpack.c.bf16 %v143_v50, %v139_v49 }
  0x43   :  { %v154_v57 = vld [vmem:[#allocation6 + $0x2b8] sm:$0xff]  ;;  %v750_v59 = vpack.c.bf16 %v145_v53, %v141_v51  ;;  %v688_v60 = vpack.c.bf16 %v152_v55, %v148_v54  ;;  %v147_v61 = vld [vmem:[#allocation6 + $0x280] sm:$0xff]  ;;  %v149_v63 = vld [vmem:[#allocation6 + $0x290] sm:$0xff] }
  0x44   :  { %675 = vmatpush1.bf16.msra.mxu0 %v674_v22  ;;  %v151_v62 = vld [vmem:[#allocation6 + $0x2a0] sm:$0xff]  ;;  %v752_v0 = vpack.c.bf16 %v154_v57, %v150_v56  ;;  %v153_v1 = vld [vmem:[#allocation6 + $0x2b0] sm:$0xff]  ;;  %v156_v2 = vld [vmem:[#allocation6 + $0x2c8] sm:$0xff] }
  0x45   :  { %739 = vmatpush1.bf16.msra.mxu1 %v738_v23  ;;  %677 = vmatprep.subr.bf16.mxu0 %v676_v24  ;;  %v160_v3 = vld [vmem:[#allocation6 + $0x2e8] sm:$0xff]  ;;  %v158_v4 = vld [vmem:[#allocation6 + $0x2d8] sm:$0xff]  ;;  %v690_v6 = vpack.c.bf16 %v151_v62, %v147_v61  ;;  %v155_v7 = vld [vmem:[#allocation6 + $0x2c0] sm:$0xff]  ;;  %v754_v8 = vpack.c.bf16 %v153_v1, %v149_v63 }
  0x46   :  { %741 = vmatprep.subr.bf16.mxu1 %v740_v28  ;;  %v162_v5 = vld [vmem:[#allocation6 + $0x2f8] sm:$0xff]  ;;  %v692_v9 = vpack.c.bf16 %v160_v3, %v156_v2  ;;  %v159_v10 = vld [vmem:[#allocation6 + $0x2e0] sm:$0xff]  ;;  %v157_v11 = vld [vmem:[#allocation6 + $0x2d0] sm:$0xff] }
  0x47   :  { %v161_v12 = vld [vmem:[#allocation6 + $0x2f0] sm:$0xff]  ;;  %v756_v13 = vpack.c.bf16 %v162_v5, %v158_v4  ;;  %v164_v14 = vld [vmem:[#allocation6 + $0x308] sm:$0xff]  ;;  %v166_v17 = vld [vmem:[#allocation6 + $0x318] sm:$0xff]  ;;  %v694_v19 = vpack.c.bf16 %v159_v10, %v155_v7  ;;  %v378_v4 = vlaneseq }
  0x48   :  { %679 = vmatpush1.bf16.msra.mxu0 %v678_v34  ;;  %v168_v15 = vld [vmem:[#allocation6 + $0x328] sm:$0xff]  ;;  %v170_v18 = vld [vmem:[#allocation6 + $0x338] sm:$0xff]  ;;  %v758_v20 = vpack.c.bf16 %v161_v12, %v157_v11  ;;  %v163_v22 = vld [vmem:[#allocation6 + $0x300] sm:$0xff] }
  0x49   :  { %743 = vmatpush1.bf16.msra.mxu1 %v742_v35  ;;  %681 = vmatprep.subr.bf16.mxu0 %v680_v36  ;;  %v64_v16 = vld [vmem:[#allocation3 + $0x8] sm:$0xff]  ;;  %v696_v21 = vpack.c.bf16 %v168_v15, %v164_v14  ;;  %v167_v23 = vld [vmem:[#allocation6 + $0x320] sm:$0xff]  ;;  %v165_v24 = vld [vmem:[#allocation6 + $0x310] sm:$0xff]  ;;  %v760_v25 = vpack.c.bf16 %v170_v18, %v166_v17  ;;  %v379_v5 = vshrl.u32 %v378_v4, 7 }
  0x4a   :  { %745 = vmatprep.subr.bf16.mxu1 %v744_v40  ;;  %259 = vmatprep.mubr.f32.mxu0 %v64_v16  ;;  %v169_v26 = vld [vmem:[#allocation6 + $0x330] sm:$0xff]  ;;  %v172_v27 = vld [vmem:[#allocation6 + $0x348] sm:$0xff]  ;;  %v174_v29 = vld [vmem:[#allocation6 + $0x358] sm:$0xff]  ;;  %v698_v31 = vpack.c.bf16 %v167_v23, %v163_v22 }
  0x4b   :  { %336 = vmatprep.mubr.f32.mxu1 %v64_v16  ;;  %v176_v28 = vld [vmem:[#allocation6 + $0x368] sm:$0xff]  ;;  %v178_v30 = vld [vmem:[#allocation6 + $0x378] sm:$0xff]  ;;  %v762_v32 = vpack.c.bf16 %v169_v26, %v165_v24  ;;  %v171_v34 = vld [vmem:[#allocation6 + $0x340] sm:$0xff]  ;;  %v392_v10 = vsub.s32 3, %v379_v5 }
  0x4c   :  { %683 = vmatpush1.bf16.msra.mxu0 %v682_v46  ;;  %v700_v33 = vpack.c.bf16 %v176_v28, %v172_v27  ;;  %v175_v35 = vld [vmem:[#allocation6 + $0x360] sm:$0xff]  ;;  %v173_v36 = vld [vmem:[#allocation6 + $0x350] sm:$0xff]  ;;  %v764_v37 = vpack.c.bf16 %v178_v30, %v174_v29  ;;  %v180_v39 = vld [vmem:[#allocation6 + $0x388] sm:$0xff] }
  0x4d   :  { %747 = vmatpush1.bf16.msra.mxu1 %v746_v47  ;;  %685 = vmatprep.subr.bf16.mxu0 %v684_v48  ;;  %v177_v38 = vld [vmem:[#allocation6 + $0x370] sm:$0xff]  ;;  %v184_v40 = vld [vmem:[#allocation6 + $0x3a8] sm:$0xff]  ;;  %v182_v41 = vld [vmem:[#allocation6 + $0x398] sm:$0xff]  ;;  %v702_v43 = vpack.c.bf16 %v175_v35, %v171_v34 }
  0x4e   :  { %749 = vmatprep.subr.bf16.mxu1 %v748_v52  ;;  %v186_v42 = vld [vmem:[#allocation6 + $0x3b8] sm:$0xff]  ;;  %v766_v44 = vpack.c.bf16 %v177_v38, %v173_v36  ;;  %v704_v45 = vpack.c.bf16 %v184_v40, %v180_v39  ;;  %v179_v46 = vld [vmem:[#allocation6 + $0x380] sm:$0xff]  ;;  %v181_v48 = vld [vmem:[#allocation6 + $0x390] sm:$0xff] }
  0x4f   :  { %v183_v47 = vld [vmem:[#allocation6 + $0x3a0] sm:$0xff]  ;;  %v768_v49 = vpack.c.bf16 %v186_v42, %v182_v41  ;;  %v185_v50 = vld [vmem:[#allocation6 + $0x3b0] sm:$0xff]  ;;  %v188_v51 = vld [vmem:[#allocation6 + $0x3c8] sm:$0xff] }
  0x50   :  { %687 = vmatpush1.bf16.msra.mxu0 %v686_v58  ;;  %v192_v52 = vld [vmem:[#allocation6 + $0x3e8] sm:$0xff]  ;;  %v190_v53 = vld [vmem:[#allocation6 + $0x3d8] sm:$0xff]  ;;  %v706_v55 = vpack.c.bf16 %v183_v47, %v179_v46  ;;  %v770_v56 = vpack.c.bf16 %v185_v50, %v181_v48  ;;  %v187_v58 = vld [vmem:[#allocation6 + $0x3c0] sm:$0xff] }
  0x51   :  { %751 = vmatpush1.bf16.msra.mxu1 %v750_v59  ;;  %689 = vmatprep.subr.bf16.mxu0 %v688_v60  ;;  %v194_v54 = vld [vmem:[#allocation6 + $0x3f8] sm:$0xff]  ;;  %v708_v57 = vpack.c.bf16 %v192_v52, %v188_v51  ;;  %v191_v59 = vld [vmem:[#allocation6 + $0x3e0] sm:$0xff]  ;;  %v189_v61 = vld [vmem:[#allocation6 + $0x3d0] sm:$0xff] }
  0x52   :  { %753 = vmatprep.subr.bf16.mxu1 %v752_v0  ;;  %v772_v60 = vpack.c.bf16 %v194_v54, %v190_v53  ;;  %v193_v62 = vld [vmem:[#allocation6 + $0x3f0] sm:$0xff]  ;;  %v710_v63 = vpack.c.bf16 %v191_v59, %v187_v58  ;;  %v63_v1 = vld [vmem:[#allocation3] sm:$0xff]  ;;  %v66_v2 = vld [vmem:[#allocation3 + $0x18] sm:$0xff] }
  0x53   :  { %v774_v0 = vpack.c.bf16 %v193_v62, %v189_v61  ;;  %v65_v3 = vld [vmem:[#allocation3 + $0x10] sm:$0xff]  ;;  %v376_v7 = vld [vmem:[%s1107_s2] sm:$0xf]  ;;  %s895_s2 = smov [#allocation8]  }
  0x54   :  { %691 = vmatpush1.bf16.msra.mxu0 %v690_v6  ;;  %v380_v6 = vsub.s32 0, %v379_v5  ;;  %v946_v14 = vrot.slane %v376_v7, %v392_v10  ;;  %s635_s13 = sshll.u32 %s895_s2, 4  ;;  %s636_s13 = int_to_ptr.vmem [resolvable:$true] %s635_s13 }
  0x55   :  { %755 = vmatpush1.bf16.msra.mxu1 %v754_v8  ;;  %693 = vmatprep.subr.bf16.mxu0 %v692_v9  ;;  %v388_v8 = vsub.s32 2, %v379_v5  ;;  %v384_v9 = vsub.s32 1, %v379_v5  ;;  %s860_s14 = scalar_lea.vmem %s636_s13, 1024  ;;  %p865_p3 = scmp.lt.s32.totalorder %s636_s13, %s636_s13 }
  0x56   :  { %757 = vmatprep.subr.bf16.mxu1 %v756_v13  ;;  %v381_v11 = vrot.slane %v376_v7, %v380_v6  ;;  %p861_p2 = scmp.ne.s32.totalorder %s636_s13, %s860_s14  ;;  %p866_p4 = scmp.lt.s32.totalorder %s860_s14, %s860_s14 }
  0x57   :  { %v389_v12 = vrot.slane %v376_v7, %v388_v8  ;;  %v385_v13 = vrot.slane %v376_v7, %v384_v9 }
  0x58   :  { %695 = vmatpush1.bf16.msra.mxu0 %v694_v19  ;;  %p867_p5 = por %p866_p4, %p865_p3 }
  0x59   :  { %759 = vmatpush1.bf16.msra.mxu1 %v758_v20  ;;  %697 = vmatprep.subr.bf16.mxu0 %v696_v21 }
  0x5a   :  { %761 = vmatprep.subr.bf16.mxu1 %v760_v25  ;;  %p868_p6 = pnand %p867_p5, %p861_p2 }
  0x5c   :  { %699 = vmatpush1.bf16.msra.mxu0 %v698_v31 }
  0x5d   :  { %763 = vmatpush1.bf16.msra.mxu1 %v762_v32  ;;  %701 = vmatprep.subr.bf16.mxu0 %v700_v33 }
  0x5e   :  { %765 = vmatprep.subr.bf16.mxu1 %v764_v37 }
  0x60   :  { %703 = vmatpush1.bf16.msra.mxu0 %v702_v43 }
  0x61   :  { %767 = vmatpush1.bf16.msra.mxu1 %v766_v44  ;;  %705 = vmatprep.subr.bf16.mxu0 %v704_v45 }
  0x62   :  { %769 = vmatprep.subr.bf16.mxu1 %v768_v49 }
  0x64   :  { %707 = vmatpush1.bf16.msra.mxu0 %v706_v55 }
  0x65   :  { %771 = vmatpush1.bf16.msra.mxu1 %v770_v56  ;;  %709 = vmatprep.subr.bf16.mxu0 %v708_v57  ;;  %v894_v56 = vmov -1.0  }
  0x66   :  { %773 = vmatprep.subr.bf16.mxu1 %v772_v60 }
  0x68   :  { %711 = vmatpush1.bf16.msra.mxu0 %v710_v63 }
  0x69   :  { %775 = vmatpush1.bf16.msra.mxu1 %v774_v0 }
  0x6b   :  { %260 = vmatmul.mubr.f32.vlgmr.msra.gmra.mrb[0].mxu0 %v63_v1 }
  0x6c   :  { %337 = vmatmul.mubr.f32.vlgmr.msra.gmra.mrb[0].mxu1 %v63_v1  ;;  %265 = vmatprep.mubr.f32.mxu0 %v66_v2 }
  0x6d   :  { %342 = vmatprep.mubr.f32.mxu1 %v66_v2 }
  0x6f   :  { %266 = vmatmul.mubr.f32.gmra.mrb[2].mxu0 %v65_v3 }
  0x70   :  { %343 = vmatmul.mubr.f32.gmra.mrb[2].mxu1 %v65_v3 }
 0x13e   :  { %v261_v15 = vpop.f32.mrb[0].mxu0 }
 0x13f   :  { %v398_v16 = vadd.f32 %v381_v11, %v261_v15  ;;  %v338_v17 = vpop.f32.mrb[0].mxu1  ;;  %v263_v18 = vpop.f32.mrb[1].mxu0 }
 0x140   :  { %v400_v19 = vadd.f32 %v389_v12, %v338_v17  ;;  %v399_v20 = vadd.f32 %v385_v13, %v263_v18  ;;  %v340_v21 = vpop.f32.mrb[1].mxu1 }
 0x141   :  { %v414_v22 = vmul.f32 0.70710677, %v398_v16  ;;  %v949_v23 = vadd.f32 %v946_v14, %v340_v21  ;;  %v967_v47 = vmul.f32 0.5, %v398_v16 }
 0x142   :  { %v416_v24 = vmul.f32 0.70710677, %v400_v19  ;;  %v951_v25 = vmul.f32 0.70710677, %v399_v20  ;;  %v267_v29 = vpop.f32.mrb[2].mxu0  ;;  %v976_v53 = vmul.f32 0.5, %v400_v19 }
 0x143   :  { %v438_v26 = vand.u32 2147483647, %v414_v22  ;;  %v954_v27 = vmul.f32 0.70710677, %v949_v23  ;;  %v344_v31 = vpop.f32.mrb[2].mxu1  ;;  %v269_v36 = vpop.f32.mrb[3].mxu0  ;;  %v958_v43 = vadd.f32 %v381_v11, %v267_v29 }
 0x144   :  { %v440_v28 = vand.u32 2147483647, %v416_v24  ;;  %v439_v33 = vand.u32 2147483647, %v951_v25  ;;  %v346_v37 = vpop.f32.mrb[3].mxu1  ;;  %v960_v44 = vadd.f32 %v389_v12, %v344_v31  ;;  %v962_v45 = vadd.f32 %v385_v13, %v269_v36 }
 0x145   :  { %v446_v30 = vmul.f32 0.3275911, %v438_v26  ;;  %v441_v35 = vand.u32 2147483647, %v954_v27  ;;  %v965_v46 = vmul.f32 0.70710677, %v958_v43  ;;  %v998_v9 = vadd.f32 %v946_v14, %v346_v37 }
 0x146   :  { %v448_v32 = vmul.f32 0.3275911, %v440_v28  ;;  %v447_v39 = vmul.f32 0.3275911, %v439_v33  ;;  %vm422_vm0 = vcmp.ge.f32.partialorder %v414_v22, 0.0  ;;  %v550_v48 = vsub.f32 0.0, %v438_v26 }
 0x147   :  { %v454_v34 = vadd.f32 1.0, %v446_v30  ;;  %v449_v40 = vmul.f32 0.3275911, %v441_v35  ;;  %v970_v49 = vmul.f32 0.70710677, %v960_v44  ;;  %v552_v50 = vsub.f32 0.0, %v440_v28 }
 0x148   :  { %v456_v38 = vadd.f32 1.0, %v448_v32  ;;  %v455_v41 = vadd.f32 1.0, %v447_v39  ;;  %v442_v51 = vand.u32 2147483647, %v965_v46  ;;  %v974_v52 = vmul.f32 0.70710677, %v962_v45 }
 0x149   :  { %784 = vrcp.f32 %v454_v34  ;;  %v457_v42 = vadd.f32 1.0, %v449_v40  ;;  %vm424_vm1 = vcmp.ge.f32.partialorder %v416_v24, 0.0  ;;  %v978_v54 = vmul.f32 0.5, %v399_v20 }
 0x14a   :  { %786 = vrcp.f32 %v456_v38  ;;  %v444_v55 = vand.u32 2147483647, %v970_v49  ;;  %v982_v57 = vsel %vm422_vm0, 1.0, %v894_v56  ;;  %v551_v58 = vsub.f32 0.0, %v439_v33 }
 0x14b   :  { %788 = vrcp.f32 %v455_v41  ;;  %v553_v59 = vsub.f32 0.0, %v441_v35  ;;  %v450_v60 = vmul.f32 0.3275911, %v442_v51  ;;  %v558_v61 = vmul.f32 %v550_v48, %v438_v26 }
 0x14c   :  { %790 = vrcp.f32 %v457_v42  ;;  %vm423_vm2 = vcmp.ge.f32.partialorder %v951_v25, 0.0  ;;  %v452_v62 = vmul.f32 0.3275911, %v444_v55  ;;  %v986_v63 = vand.u32 2147483647, %v974_v52 }
 0x14d   :  { %v991_v1 = vsel %vm424_vm1, 1.0, %v894_v56  ;;  %v560_v2 = vmul.f32 %v552_v50, %v440_v28  ;;  %v458_v3 = vadd.f32 1.0, %v450_v60  ;;  %v554_v4 = vsub.f32 0.0, %v442_v51 }
 0x14e   :  { %v460_v7 = vadd.f32 1.0, %v452_v62  ;;  %v451_v8 = vmul.f32 0.3275911, %v986_v63  ;;  %v559_v11 = vmul.f32 %v551_v58, %v439_v33  ;;  %v561_v12 = vmul.f32 %v553_v59, %v441_v35 }
 0x14f   :  { %792 = vrcp.f32 %v458_v3  ;;  %v566_v15 = vmul.f32 1.442695, %v558_v61  ;;  %v1006_v19 = vsel %vm423_vm2, 1.0, %v894_v56  ;;  %v562_v20 = vmul.f32 %v554_v4, %v442_v51 }
 0x150   :  { %794 = vrcp.f32 %v460_v7  ;;  %v459_v16 = vadd.f32 1.0, %v451_v8  ;;  %v556_v14 = vsub.f32 0.0, %v444_v55  ;;  %v570_v22 = vmul.f32 1.442695, %v560_v2 }
 0x151   :  { %vm425_vm3 = vcmp.ge.f32.partialorder %v954_v27, 0.0  ;;  %v1012_v26 = vmul.f32 0.70710677, %v998_v9  ;;  %v568_v30 = vmul.f32 1.442695, %v559_v11  ;;  %v555_v42 = vsub.f32 0.0, %v986_v63 }
 0x152   :  { %v572_v25 = vmul.f32 1.442695, %v561_v12  ;;  %796 = vrcp.f32 %v459_v16  ;;  %v574_v35 = vmul.f32 1.442695, %v562_v20  ;;  %v564_v36 = vmul.f32 %v556_v14, %v444_v55 }
 0x153   :  { %v988_v0 = vpop.eup %784  ;;  %798 = vpow2.f32 %v566_v15  ;;  %v1019_v37 = vand.u32 2147483647, %v1012_v26  ;;  %v433_v20 = vsel %vm425_vm3, 1.0, %v894_v56  ;;  %vm426_vm4 = vcmp.ge.f32.partialorder %v965_v46, 0.0 }
 0x154   :  { %v993_v5 = vpop.eup %786  ;;  %v478_v6 = vmul.f32 1.0614054, %v988_v0  ;;  %800 = vpow2.f32 %v570_v22  ;;  %v578_v60 = vmul.f32 1.442695, %v564_v36  ;;  %vm428_vm5 = vcmp.ge.f32.partialorder %v970_v49, 0.0 }
 0x155   :  { %v480_v10 = vmul.f32 1.0614054, %v993_v5  ;;  %v1001_v17 = vpop.eup %788  ;;  %802 = vpow2.f32 %v568_v30  ;;  %v453_v48 = vmul.f32 0.3275911, %v1019_v37  ;;  %vm427_vm6 = vcmp.ge.f32.partialorder %v974_v52, 0.0 }
 0x156   :  { %v486_v13 = vadd.f32 -1.4531521, %v478_v6  ;;  %v479_v24 = vmul.f32 1.0614054, %v1001_v17  ;;  %v1014_v28 = vpop.eup %790  ;;  %804 = vpow2.f32 %v572_v25  ;;  %v411_v52 = vmul.f32 0.5, %v962_v45 }
 0x157   :  { %v488_v18 = vadd.f32 -1.4531521, %v480_v10  ;;  %v481_v33 = vmul.f32 1.0614054, %v1014_v28  ;;  %806 = vpow2.f32 %v574_v35  ;;  %v461_v61 = vadd.f32 1.0, %v453_v48 }
 0x158   :  { %v494_v21 = vmul.f32 %v988_v0, %v486_v13  ;;  %v487_v32 = vadd.f32 -1.4531521, %v479_v24  ;;  %v563_v10 = vmul.f32 %v555_v42, %v986_v63  ;;  %vm429_vm7 = vcmp.ge.f32.partialorder %v1012_v26, 0.0 }
 0x159   :  { %v496_v29 = vmul.f32 %v993_v5, %v488_v18  ;;  %v489_v40 = vadd.f32 -1.4531521, %v481_v33  ;;  %v1027_v58 = vpop.eup %792  ;;  %808 = vrcp.f32 %v461_v61 }
 0x15a   :  { %v502_v31 = vadd.f32 1.4214138, %v494_v21  ;;  %v495_v39 = vmul.f32 %v1001_v17, %v487_v32  ;;  %v1029_v62 = vpop.eup %794  ;;  %v482_v6 = vmul.f32 1.0614054, %v1027_v58  ;;  %810 = vpow2.f32 %v578_v60 }
 0x15b   :  { %v504_v34 = vadd.f32 1.4214138, %v496_v29  ;;  %v497_v55 = vmul.f32 %v1014_v28, %v489_v40  ;;  %v484_v8 = vmul.f32 1.0614054, %v1029_v62  ;;  %v576_v32 = vmul.f32 1.442695, %v563_v10 }
 0x15c   :  { %v510_v38 = vmul.f32 %v988_v0, %v502_v31  ;;  %v503_v51 = vadd.f32 1.4214138, %v495_v39  ;;  %v490_v15 = vadd.f32 -1.4531521, %v482_v6  ;;  %v1038_v16 = vpop.eup %796 }
 0x15d   :  { %v512_v41 = vmul.f32 %v993_v5, %v504_v34  ;;  %v505_v4 = vadd.f32 1.4214138, %v497_v55  ;;  %v492_v14 = vadd.f32 -1.4531521, %v484_v8  ;;  %v799_v21 = vpop.eup %798  ;;  %v483_v31 = vmul.f32 1.0614054, %v1038_v16 }
 0x15e   :  { %v518_v50 = vadd.f32 -0.28449672, %v510_v38  ;;  %v511_v3 = vmul.f32 %v1001_v17, %v503_v51  ;;  %v498_v29 = vmul.f32 %v1027_v58, %v490_v15  ;;  %v801_v33 = vpop.eup %800  ;;  %812 = vpow2.f32 %v576_v32 }
 0x15f   :  { %v520_v59 = vadd.f32 -0.28449672, %v512_v41  ;;  %v513_v13 = vmul.f32 %v1014_v28, %v505_v4  ;;  %v500_v25 = vmul.f32 %v1029_v62, %v492_v14  ;;  %v803_v38 = vpop.eup %802  ;;  %v491_v40 = vadd.f32 -1.4531521, %v483_v31 }
 0x160   :  { %v526_v2 = vmul.f32 %v988_v0, %v518_v50  ;;  %v519_v12 = vadd.f32 -0.28449672, %v511_v3  ;;  %v506_v36 = vadd.f32 1.4214138, %v498_v29  ;;  %v557_v41 = vsub.f32 0.0, %v1019_v37  ;;  %v805_v42 = vpop.eup %804 }
 0x161   :  { %v528_v7 = vmul.f32 %v993_v5, %v520_v59  ;;  %v521_v24 = vadd.f32 -0.28449672, %v513_v13  ;;  %v508_v39 = vadd.f32 1.4214138, %v500_v25  ;;  %v807_v55 = vpop.eup %806  ;;  %v499_v61 = vmul.f32 %v1038_v16, %v491_v40 }
 0x162   :  { %v534_v11 = vadd.f32 0.2548296, %v526_v2  ;;  %v527_v63 = vmul.f32 %v1001_v17, %v519_v12  ;;  %v514_v51 = vmul.f32 %v1027_v58, %v506_v36 }
 0x163   :  { %v536_v18 = vadd.f32 0.2548296, %v528_v7  ;;  %v529_v35 = vmul.f32 %v1014_v28, %v521_v24  ;;  %v516_v60 = vmul.f32 %v1029_v62, %v508_v39  ;;  %v1057_v7 = vpop.eup %808  ;;  %v507_v10 = vadd.f32 1.4214138, %v499_v61 }
 0x164   :  { %v542_v22 = vmul.f32 %v988_v0, %v534_v11  ;;  %v535_v34 = vadd.f32 0.2548296, %v527_v63  ;;  %v522_v6 = vadd.f32 -0.28449672, %v514_v51  ;;  %v565_v11 = vmul.f32 %v557_v41, %v1019_v37  ;;  %v811_v14 = vpop.eup %810 }
 0x165   :  { %v544_v30 = vmul.f32 %v993_v5, %v536_v18  ;;  %v537_v50 = vadd.f32 0.2548296, %v529_v35  ;;  %v524_v8 = vadd.f32 -0.28449672, %v516_v60  ;;  %v409_v35 = vmul.f32 0.5, %v949_v23 }
 0x166   :  { %v582_v27 = vmul.f32 %v799_v21, %v542_v22  ;;  %v543_v5 = vmul.f32 %v1001_v17, %v535_v34  ;;  %v530_v18 = vmul.f32 %v1027_v58, %v522_v6  ;;  %v485_v22 = vmul.f32 1.0614054, %v1057_v7 }
 0x167   :  { %v584_v0 = vmul.f32 %v801_v33, %v544_v30  ;;  %v545_v4 = vmul.f32 %v1014_v28, %v537_v50  ;;  %v515_v28 = vmul.f32 %v1038_v16, %v507_v10  ;;  %v580_v34 = vmul.f32 1.442695, %v565_v11 }
 0x168   :  { %v590_v48 = vsub.f32 1.0, %v582_v27  ;;  %v583_v3 = vmul.f32 %v803_v38, %v543_v5  ;;  %v538_v29 = vadd.f32 0.2548296, %v530_v18  ;;  %v493_v31 = vadd.f32 -1.4531521, %v485_v22  ;;  %v813_v39 = vpop.eup %812 }
 0x169   :  { %v592_v59 = vsub.f32 1.0, %v584_v0  ;;  %v585_v15 = vmul.f32 %v805_v42, %v545_v4  ;;  %v523_v25 = vadd.f32 -0.28449672, %v515_v28  ;;  %814 = vpow2.f32 %v580_v34 }
 0x16a   :  { %v598_v2 = vmul.f32 %v590_v48, %v982_v57  ;;  %v591_v13 = vsub.f32 1.0, %v583_v3  ;;  %v532_v57 = vmul.f32 %v1029_v62, %v524_v8  ;;  %v546_v27 = vmul.f32 %v1027_v58, %v538_v29 }
 0x16b   :  { %v600_v17 = vmul.f32 %v592_v59, %v991_v1  ;;  %v593_v24 = vsub.f32 1.0, %v585_v15  ;;  %v501_v36 = vmul.f32 %v1057_v7, %v493_v31  ;;  %v436_v5 = vsel %vm428_vm5, 1.0, %v894_v56 }
 0x16c   :  { %v606_v12 = vadd.f32 1.0, %v598_v2  ;;  %v599_v1 = vmul.f32 %v591_v13, %v1006_v19  ;;  %v540_v30 = vadd.f32 0.2548296, %v532_v57  ;;  %v531_v19 = vmul.f32 %v1038_v16, %v523_v25 }
 0x16d   :  { %v608_v21 = vadd.f32 1.0, %v600_v17  ;;  %v601_v33 = vmul.f32 %v593_v24, %v433_v20  ;;  %v586_v0 = vmul.f32 %v807_v55, %v546_v27  ;;  %v509_v40 = vadd.f32 1.4214138, %v501_v36 }
 0x16e   :  { %v614_v63 = vmul.f32 %v606_v12, %v967_v47  ;;  %v607_v32 = vadd.f32 1.0, %v599_v1  ;;  %v548_v47 = vmul.f32 %v1029_v62, %v540_v30  ;;  %v539_v20 = vadd.f32 0.2548296, %v531_v19 }
 0x16f   :  { %v616_v37 = vmul.f32 %v608_v21, %v976_v53  ;;  %v609_v38 = vadd.f32 1.0, %v601_v33  ;;  %v594_v41 = vsub.f32 1.0, %v586_v0  ;;  %v434_v62 = vsel %vm426_vm4, 1.0, %v894_v56 }
 0x170   :  { %622 = vst [vmem:[#allocation8] sm:$0xff] %v614_v63  ;;  %v615_v53 = vmul.f32 %v607_v32, %v978_v54  ;;  %v588_v58 = vmul.f32 %v811_v14, %v548_v47  ;;  %v547_v48 = vmul.f32 %v1038_v16, %v539_v20  ;;  %v517_v54 = vmul.f32 %v1057_v7, %v509_v40 }
 0x171   :  { %624 = vst [vmem:[#allocation8 + $0x10] sm:$0xff] %v616_v37  ;;  %v617_v23 = vmul.f32 %v609_v38, %v409_v35  ;;  %v602_v46 = vmul.f32 %v594_v41, %v434_v62  ;;  %v410_v55 = vmul.f32 0.5, %v958_v43  ;;  %v412_v60 = vmul.f32 0.5, %v960_v44 }
 0x172   :  { %623 = vst [vmem:[#allocation8 + $0x8] sm:$0xff] %v615_v53  ;;  %v596_v42 = vsub.f32 1.0, %v588_v58  ;;  %v587_v49 = vmul.f32 %v813_v39, %v547_v48  ;;  %v525_v51 = vadd.f32 -0.28449672, %v517_v54  ;;  %v435_v4 = vsel %vm427_vm6, 1.0, %v894_v56 }
 0x173   :  { %625 = vst [vmem:[#allocation8 + $0x18] sm:$0xff] %v617_v23  ;;  %v610_v59 = vadd.f32 1.0, %v602_v46  ;;  %v815_v11 = vpop.eup %814  ;;  %v437_v15 = vsel %vm429_vm7, 1.0, %v894_v56  ;;  %v413_v14 = vmul.f32 0.5, %v998_v9 }
 0x174   :  { %v604_v50 = vmul.f32 %v596_v42, %v436_v5  ;;  %v595_v2 = vsub.f32 1.0, %v587_v49  ;;  %v533_v16 = vmul.f32 %v1057_v7, %v525_v51 }
 0x175   :  { %v618_v3 = vmul.f32 %v610_v59, %v410_v55 }
 0x176   :  { %v612_v61 = vadd.f32 1.0, %v604_v50  ;;  %v603_v17 = vmul.f32 %v595_v2, %v435_v4  ;;  %v541_v8 = vadd.f32 0.2548296, %v533_v16 }
 0x177   :  { %626 = vst [vmem:[#allocation8 + $0x20] sm:$0xff] %v618_v3 }
 0x178   :  { %v620_v6 = vmul.f32 %v612_v61, %v412_v60  ;;  %v611_v10 = vadd.f32 1.0, %v603_v17  ;;  %v549_v43 = vmul.f32 %v1057_v7, %v541_v8 }
 0x17a   :  { %628 = vst [vmem:[#allocation8 + $0x30] sm:$0xff] %v620_v6  ;;  %v619_v12 = vmul.f32 %v611_v10, %v411_v52  ;;  %v589_v44 = vmul.f32 %v815_v11, %v549_v43 }
 0x17c   :  { %627 = vst [vmem:[#allocation8 + $0x28] sm:$0xff] %v619_v12  ;;  %v597_v13 = vsub.f32 1.0, %v589_v44 }
 0x17e   :  { %v605_v18 = vmul.f32 %v597_v13, %v437_v15 }
 0x180   :  { %v613_v21 = vadd.f32 1.0, %v605_v18 }
 0x182   :  { %v621_v57 = vmul.f32 %v613_v21, %v413_v14 }
 0x184   :  { %629 = vst [vmem:[#allocation8 + $0x38] sm:$0xff] %v621_v57 }
 0x185   :  { %871 = shalt.err (!%p868_p6)
}
 0x186   :  { %s872_s17 = scalar_lea.hbm %s1108_s3, 1024 }
 0x187   :  { %p873_p7 = scmp.ne.s32.totalorder %s1108_s3, %s872_s17  ;;  %p876_p8 = scmp.lt.u32.totalorder %s872_s17, %s1108_s3 }
 0x189   :  { %p878_p9 = pnand %p876_p8, %p873_p7 }
 0x18b   :  { %881 = shalt.err (!%p878_p9)
}
 0x18c   :  { %641 = dma.vmem_to_hbm [thread:$0]  %s636_s13, 1024, %s1108_s3, [#allocation5], %s892_s0, %s892_s0, %s893_s9  }
 0x18d   :  { %886 = dma.done.wait [#allocation5], 1024  }
 0x18e   :  { %887 = vsyncadd [#allocation5], 4294966272 }
 0x18f   :  { %645 = vsyncpa [#allocation4], 1 }
 0x190   :  { %646 = vsyncpa [#allocation7], 1 }
 0x191   :  { %647 = vsyncpa [#allocation5], 1 }

</bundles_post_ra>
